<compile_context>
chip_gen: v7x
topology: tpu7x:2x2x1
jax: 0.10.0
libtpu: 0.0.40
codegen_flags: <defaults>
</compile_context>

<pallas_src>
import jax
import jax.numpy as jnp
import numpy as np
from jax.experimental import pallas as pl
from jax.experimental.pallas import tpu as pltpu


def _dyadic_fused_kernel(sigs_ref,   # (TB, P*C_sig)  f32  batch tile, lane-dense
                         wf_ref,     # (P*C_sig, H)   f32  fused (inner ∘ linear_one) weight
                         bf_ref,     # (1, H)         f32  fused bias
                         w2_ref,     # (H, O)         f32  linear_two
                         b2_ref,     # (1, O)         f32
                         out_ref):   # (TB, O)        f32
    # One fused matmul replaces {P per-piece matmuls + concat + linear_one}.
    h = jnp.dot(sigs_ref[...], wf_ref[...],
                preferred_element_type=jnp.float32) + bf_ref[...]
    h = jnp.maximum(h, 0.0)                                   # ReLU
    out_ref[...] = (jnp.dot(h, w2_ref[...],
                            preferred_element_type=jnp.float32)
                    + b2_ref[...]).astype(out_ref.dtype)


def dyadic_model_individual(sigs, w_in, b_in, w1, b1, w2, b2, *, block_b=256):
    """sigs: (P, B, C_sig) float32; returns (B, out_channels) float32."""
    P, B, C = sigs.shape
    M = w_in.shape[1]
    H = w1.shape[1]
    O = w2.shape[1]
    K = P * C

    # ---- one-time algebraic fusion (wrapper-side, outside the kernel) ----
    # W1 viewed per-piece as (P, M, H); fused weight is concat_p(W_in @ W1_p),
    # fused bias is sum_p(b_in @ W1_p) + b1.
    w1_p = w1.reshape(P, M, H)
    w_fused = jnp.einsum('cm,pmh->pch', w_in, w1_p).reshape(K, H)
    b_fused = (jnp.einsum('m,pmh->h', b_in.reshape(M), w1_p)
               + b1.reshape(H)).reshape(1, H)

    # ---- lane-dense LHS: (P, B, C) -> (B, P*C), same order as torch.cat ----
    sigs_flat = jnp.transpose(sigs, (1, 0, 2)).reshape(B, K)

    # ---- batch tiling (grid over B; weights VMEM-resident) ----
    tb = min(block_b, B)
    b_pad = pl.cdiv(B, tb) * tb
    if b_pad != B:
        sigs_flat = jnp.pad(sigs_flat, ((0, b_pad - B), (0, 0)))
    grid = (b_pad // tb,)

    out = pl.pallas_call(
        _dyadic_fused_kernel,
        out_shape=jax.ShapeDtypeStruct((b_pad, O), jnp.float32),
        grid=grid,
        in_specs=[
            pl.BlockSpec((tb, K), lambda i: (i, 0)),    # batch-tiled sigs
            pl.BlockSpec((K, H), lambda i: (0, 0)),     # weights: constant index_map
            pl.BlockSpec((1, H), lambda i: (0, 0)),     #   -> stay resident in VMEM
            pl.BlockSpec((H, O), lambda i: (0, 0)),
            pl.BlockSpec((1, O), lambda i: (0, 0)),
        ],
        out_specs=pl.BlockSpec((tb, O), lambda i: (i, 0)),
        compiler_params=pltpu.CompilerParams(
            dimension_semantics=("parallel",)),         # megacore sharding on v7x
    )(sigs_flat, w_fused, b_fused, w2, b2)
    return out[:B]


def _reference(sigs, w_in, b_in, w1, b1, w2, b2):
    # Pure-JAX reference mirroring the PyTorch forward exactly (unfused).
    xs = [sigs[p] @ w_in + b_in for p in range(sigs.shape[0])]
    x = jnp.concatenate(xs, axis=1)
    x = jnp.maximum(x @ w1 + b1, 0.0)
    return x @ w2 + b2


if __name__ == "__main__":
    # Small shapes consistent with the module.
    batch = 512              # tiled over the grid, TB = 256
    sig_channels = 16        # feature size of each signature
    dyadic_depth = 2
    num_pieces = sum(2 ** i for i in range(dyadic_depth + 1))   # = 7
    model_out_channels = 8   # inner model's "hidden layer size"
    hidden_channels = 32
    out_channels = 4

    key = jax.random.PRNGKey(0)
    k_sig, k_win, k_bin, k_w1, k_b1, k_w2, k_b2 = jax.random.split(key, 7)

    # Stacked dyadic signature pieces, layout (P, B, C_sig).
    sigs = jax.random.normal(k_sig, (num_pieces, batch, sig_channels), jnp.float32)

    # Deterministic parameter init (stored as (in, out), i.e. W^T of nn.Linear).
    w_in = jax.random.normal(k_win, (sig_channels, model_out_channels), jnp.float32) * 0.1
    b_in = jax.random.normal(k_bin, (1, model_out_channels), jnp.float32) * 0.1
    w1 = jax.random.normal(k_w1, (num_pieces * model_out_channels, hidden_channels), jnp.float32) * 0.1
    b1 = jax.random.normal(k_b1, (1, hidden_channels), jnp.float32) * 0.1
    w2 = jax.random.normal(k_w2, (hidden_channels, out_channels), jnp.float32) * 0.1
    b2 = jax.random.normal(k_b2, (1, out_channels), jnp.float32) * 0.1

    out = dyadic_model_individual(sigs, w_in, b_in, w1, b1, w2, b2)
    out = jax.block_until_ready(out)

    ref = _reference(sigs, w_in, b_in, w1, b1, w2, b2)
    np.testing.assert_allclose(np.asarray(out), np.asarray(ref), rtol=1e-5, atol=1e-5)

    print("KERNEL_OK")
</pallas_src>

<mosaic_0001>
module attributes {stable_mosaic.version = 11 : i64} {
  func.func @_dyadic_fused_kernel(%arg0: i32, %arg1: memref<256x112xf32, #tpu.memory_space<vmem>>, %arg2: memref<112x32xf32, #tpu.memory_space<vmem>>, %arg3: memref<1x32xf32, #tpu.memory_space<vmem>>, %arg4: memref<32x4xf32, #tpu.memory_space<vmem>>, %arg5: memref<1x4xf32, #tpu.memory_space<vmem>>, %arg6: memref<256x4xf32, #tpu.memory_space<vmem>>) attributes {dimension_semantics = [#tpu.dimension_semantics<parallel>], iteration_bounds = array<i64: 2>, scalar_prefetch = 0 : i64, scratch_operands = 0 : i64, tpu.core_type = #tpu.core_type<tc>, window_params = [{transform_indices = @transform_0, window_bounds = array<i64: 256, 112>}, {pipeline_mode = #tpu.pipeline_mode<synchronous>, transform_indices = @transform_1, window_bounds = array<i64: 112, 32>}, {pipeline_mode = #tpu.pipeline_mode<synchronous>, transform_indices = @transform_2, window_bounds = array<i64: 1, 32>}, {pipeline_mode = #tpu.pipeline_mode<synchronous>, transform_indices = @transform_3, window_bounds = array<i64: 32, 4>}, {pipeline_mode = #tpu.pipeline_mode<synchronous>, transform_indices = @transform_4, window_bounds = array<i64: 1, 4>}, {transform_indices = @transform_5, window_bounds = array<i64: 256, 4>}]} {
    %c0 = arith.constant 0 : index
    %c0_0 = arith.constant 0 : index
    %0 = vector.load %arg1[%c0, %c0_0] : memref<256x112xf32, #tpu.memory_space<vmem>>, vector<256x112xf32>
    %c0_1 = arith.constant 0 : index
    %c0_2 = arith.constant 0 : index
    %1 = vector.load %arg2[%c0_1, %c0_2] : memref<112x32xf32, #tpu.memory_space<vmem>>, vector<112x32xf32>
    %cst = arith.constant dense<0.000000e+00> : vector<256x32xf32>
    %2 = tpu.matmul %0, %1, %cst {dimension_numbers = #tpu.dot_dimension_numbers<[1], [0], [0], [1], [0, 0, 1, 1], [], []>} : vector<256x112xf32>, vector<112x32xf32>, vector<256x32xf32> -> vector<256x32xf32>
    %c0_3 = arith.constant 0 : index
    %c0_4 = arith.constant 0 : index
    %3 = vector.load %arg3[%c0_3, %c0_4] : memref<1x32xf32, #tpu.memory_space<vmem>>, vector<1x32xf32>
    %4 = vector.broadcast %3 : vector<1x32xf32> to vector<256x32xf32>
    %5 = arith.addf %2, %4 : vector<256x32xf32>
    %cst_5 = arith.constant 0.000000e+00 : f32
    %6 = vector.broadcast %cst_5 : f32 to vector<256x32xf32>
    %7 = arith.maximumf %5, %6 : vector<256x32xf32>
    %c0_6 = arith.constant 0 : index
    %c0_7 = arith.constant 0 : index
    %8 = vector.load %arg4[%c0_6, %c0_7] : memref<32x4xf32, #tpu.memory_space<vmem>>, vector<32x4xf32>
    %cst_8 = arith.constant dense<0.000000e+00> : vector<256x4xf32>
    %9 = tpu.matmul %7, %8, %cst_8 {dimension_numbers = #tpu.dot_dimension_numbers<[1], [0], [0], [1], [0, 0, 1, 1], [], []>} : vector<256x32xf32>, vector<32x4xf32>, vector<256x4xf32> -> vector<256x4xf32>
    %c0_9 = arith.constant 0 : index
    %c0_10 = arith.constant 0 : index
    %10 = vector.load %arg5[%c0_9, %c0_10] : memref<1x4xf32, #tpu.memory_space<vmem>>, vector<1x4xf32>
    %11 = vector.broadcast %10 : vector<1x4xf32> to vector<256x4xf32>
    %12 = arith.addf %9, %11 : vector<256x4xf32>
    %c0_11 = arith.constant 0 : index
    %c0_12 = arith.constant 0 : index
    %13 = vector.load %arg6[%c0_11, %c0_12] : memref<256x4xf32, #tpu.memory_space<vmem>>, vector<256x4xf32>
    tpu.vector_store %arg6[%c0_11, %c0_12], %12 {strides = array<i32>} : memref<256x4xf32, #tpu.memory_space<vmem>>, vector<256x4xf32>,
    return
  }
  func.func @transform_0(%arg0: i32) -> (i32, i32) {
    %c0_i32 = arith.constant 0 : i32
    %c0_i32_0 = arith.constant 0 : i32
    return %arg0, %c0_i32 : i32, i32
  }
  func.func @transform_1(%arg0: i32) -> (i32, i32) {
    %c0_i32 = arith.constant 0 : i32
    %c0_i32_0 = arith.constant 0 : i32
    %c0_i32_1 = arith.constant 0 : i32
    return %c0_i32, %c0_i32_0 : i32, i32
  }
  func.func @transform_2(%arg0: i32) -> (i32, i32) {
    %c0_i32 = arith.constant 0 : i32
    %c0_i32_0 = arith.constant 0 : i32
    %c0_i32_1 = arith.constant 0 : i32
    return %c0_i32, %c0_i32_0 : i32, i32
  }
  func.func @transform_3(%arg0: i32) -> (i32, i32) {
    %c0_i32 = arith.constant 0 : i32
    %c0_i32_0 = arith.constant 0 : i32
    %c0_i32_1 = arith.constant 0 : i32
    return %c0_i32, %c0_i32_0 : i32, i32
  }
  func.func @transform_4(%arg0: i32) -> (i32, i32) {
    %c0_i32 = arith.constant 0 : i32
    %c0_i32_0 = arith.constant 0 : i32
    %c0_i32_1 = arith.constant 0 : i32
    return %c0_i32, %c0_i32_0 : i32, i32
  }
  func.func @transform_5(%arg0: i32) -> (i32, i32) {
    %c0_i32 = arith.constant 0 : i32
    %c0_i32_0 = arith.constant 0 : i32
    return %arg0, %c0_i32 : i32, i32
  }
}

</mosaic_0001>

<bundles_post_ra>
// kernel: tpu_custom_call.1
= control target key start
LH: loop header
LB: loop body
LE: loop exit
PB: predicated region body
PF: predicated region fallthrough
CT: control target
= control target key end

     0   :  { %s1430_s18 = smov 0   ;;  %s1746_s0 = inlined_call_operand.vmem [shape: f32[512,112], index: 0, kind: input, shape index: {}]   ;;  %s1747_s1 = inlined_call_operand.vmem [shape: f32[112,32], index: 1, kind: input, shape index: {}]   ;;  %s1748_s2 = inlined_call_operand.vmem [shape: f32[1,32], index: 2, kind: input, shape index: {}]   ;;  %s1749_s3 = inlined_call_operand.vmem [shape: f32[32,4], index: 3, kind: input, shape index: {}]   ;;  %s1750_s4 = inlined_call_operand.vmem [shape: f32[1,4], index: 4, kind: input, shape index: {}]   ;;  %s1751_s5 = inlined_call_operand.vmem [shape: f32[512,4], index: 5, kind: output, shape index: {}]  }
   0x1 LB: > { %s1057_s19 = sadd.s32 4294967295, %s1398_s18   ;;  %p1061_p0 = scmp.ge.s32.totalorder %s1398_s18, 1  ;;  %s1398_s18 = sphi %s1430_s18, %s15_s18  }
   0x2   : > { %p188_p1 = scmp.lt.s32.totalorder %s1398_s18, 3 }
   0x4   : > { %p189_p2 = pnand %p1061_p0, %p188_p1 }
   0x5   : > { %v260_v0 = vld [vmem:[%s1747_s1] sm:$0xff] (!%p189_p2)  ;;  %v261_v1 = vld [vmem:[%s1747_s1 + $0x8] sm:$0xff] (!%p189_p2)  ;;  %v262_v2 = vld [vmem:[%s1747_s1 + $0x10] sm:$0xff] (!%p189_p2)  ;;  %s1062_s26 = sshll.u32 (!%p189_p2), %s1057_s19, 5  ;;  %vm281_vm0 = vcmask (!%p189_p2), 916480   ;;  %vm646_vm1 = vcmask (!%p189_p2), 261120  }
   0x6   : > { %192 = sbr.rel (%p189_p2) target bundleno = 530 (0x212), region = 40  ;;  %v1348_v3 = vpack.c.bf16 (!%p189_p2), %v261_v1, %v260_v0  ;;  %v263_v4 = vld [vmem:[%s1747_s1 + $0x18] sm:$0xff] (!%p189_p2)  ;;  %p217_p3 = scmp.lt.s32.totalorder (!%p189_p2), %s1062_s26, 63  ;;  %v264_v6 = vld [vmem:[%s1747_s1 + $0x20] sm:$0xff] (!%p189_p2)  ;;  %v265_v7 = vld [vmem:[%s1747_s1 + $0x28] sm:$0xff] (!%p189_p2)  ;;  %vm968_vm2 = vcmask (!%p189_p2), 31744  }
   0x7   : > { %v1352_v5 = vpack.c.bf16 (!%p189_p2), %v263_v4, %v262_v2  ;;  %v635_v8 = vld [vmem:[%s1749_s3] sm:$0xff] (!%p189_p2)  ;;  %v1356_v9 = vpack.c.bf16 (!%p189_p2), %v265_v7, %v264_v6  ;;  %v636_v10 = vld [vmem:[%s1749_s3 + $0x8] sm:$0xff] (!%p189_p2)  ;;  %v266_v11 = vld [vmem:[%s1747_s1 + $0x30] sm:$0xff] (!%p189_p2) }
   0x8   : > { %1349 = vmatprep.subr.bf16.mxu0 (!%p189_p2), %v1348_v3  ;;  %v267_v12 = vld [vmem:[%s1747_s1 + $0x38] sm:$0xff] (!%p189_p2)  ;;  %v1376_v13 = vpack.c.bf16 (!%p189_p2), %v636_v10, %v635_v8  ;;  %v268_v16 = vld [vmem:[%s1747_s1 + $0x40] sm:$0xff] (!%p189_p2)  ;;  %v269_v17 = vld [vmem:[%s1747_s1 + $0x48] sm:$0xff] (!%p189_p2) }
   0x9   : > { %1351 = vmatpush3.bf16.msra.mxu0 (!%p189_p2), %v1348_v3  ;;  %v1360_v15 = vpack.c.bf16 (!%p189_p2), %v267_v12, %v266_v11  ;;  %v1364_v18 = vpack.c.bf16 (!%p189_p2), %v269_v17, %v268_v16  ;;  %v270_v19 = vld [vmem:[%s1747_s1 + $0x50] sm:$0xff] (!%p189_p2)  ;;  %v271_v20 = vld [vmem:[%s1747_s1 + $0x58] sm:$0xff] (!%p189_p2)  ;;  %v272_v22 = vld [vmem:[%s1747_s1 + $0x60] sm:$0xff] (!%p189_p2) }
   0xa   : > { %1353 = vmatprep.subr.bf16.mxu0 (!%p189_p2), %v1352_v5  ;;  %1377 = vmatprep.subr.bf16.mxu1 (!%p189_p2), %v1376_v13  ;;  %v1368_v21 = vpack.c.bf16 (!%p189_p2), %v271_v20, %v270_v19  ;;  %v273_v23 = vld [vmem:[%s1747_s1 + $0x68] sm:$0xff] (!%p189_p2)  ;;  %v637_v56 = vld [vmem:[%s1749_s3 + $0x10] sm:$0xff] (!%p189_p2)  ;;  %v638_v57 = vld [vmem:[%s1749_s3 + $0x18] sm:$0xff] (!%p189_p2) }
   0xb   : > { %1379 = vmatpush3.bf16.msra.mxu1 (!%p189_p2), %v1376_v13  ;;  %v1372_v24 = vpack.c.bf16 (!%p189_p2), %v273_v23, %v272_v22  ;;  %v1380_v58 = vpack.c.bf16 (!%p189_p2), %v638_v57, %v637_v56  ;;  %v1569_v59 = vld [vmem:[%s1748_s2] ss:$0 sm:$0xff] (!%p189_p2) }
   0xd   : > { %s1753_s26 = smov (!%p217_p3, %s1062_s26), 63  ;;  %1355 = vmatpush3.bf16.msra.mxu0 %v1352_v5  ;;  %1381 = vmatprep.subr.bf16.mxu1 %v1380_v58 }
   0xe   : > { %s1063_s10 = sshll.u32 %s1753_s26, 3  ;;  %1357 = vmatprep.subr.bf16.mxu0 %v1356_v9 }
   0xf   : > { %s1476_s20 = scalar_lea.vmem %s1746_s0, %s1063_s10  ;;  %1383 = vmatpush3.bf16.msra.mxu1 %v1380_v58  ;;  %s1645_s21 = scalar_lea.vmem %s1751_s5, %s1063_s10 }
  0x10   : > { %v228_v14 = vld [vmem:[%s1476_s20] sm:$0xff]  ;;  %v229_v25 = vld [vmem:[%s1476_s20 + $0x8] sm:$0xff]  ;;  %v230_v26 = vld [vmem:[%s1476_s20 + $0x10] sm:$0xff] }
  0x11   : > { %1244 = vmatprep.mubr.msk.f32.mxu0 %vm281_vm0, %v228_v14  ;;  %1359 = vmatpush3.bf16.msra.mxu0 %v1356_v9  ;;  %v231_v27 = vld [vmem:[%s1476_s20 + $0x18] sm:$0xff]  ;;  %v232_v28 = vld [vmem:[%s1476_s20 + $0x20] sm:$0xff]  ;;  %v233_v29 = vld [vmem:[%s1476_s20 + $0x28] sm:$0xff] }
  0x12   : > { %1361 = vmatprep.subr.bf16.mxu0 %v1360_v15  ;;  %v234_v30 = vld [vmem:[%s1476_s20 + $0x30] sm:$0xff]  ;;  %v235_v31 = vld [vmem:[%s1476_s20 + $0x38] sm:$0xff]  ;;  %v236_v32 = vld [vmem:[%s1476_s20 + $0x40] sm:$0xff] }
  0x13   : > { %v237_v33 = vld [vmem:[%s1476_s20 + $0x48] sm:$0xff]  ;;  %v238_v34 = vld [vmem:[%s1476_s20 + $0x50] sm:$0xff]  ;;  %v239_v35 = vld [vmem:[%s1476_s20 + $0x58] sm:$0xff] }
  0x14   : > { %v240_v36 = vld [vmem:[%s1476_s20 + $0x60] sm:$0xff]  ;;  %v241_v37 = vld [vmem:[%s1476_s20 + $0x68] sm:$0xff]  ;;  %v242_v38 = vld [vmem:[%s1476_s20 + $0x70] sm:$0xff] }
  0x15   : > { %1363 = vmatpush3.bf16.msra.mxu0 %v1360_v15  ;;  %v243_v39 = vld [vmem:[%s1476_s20 + $0x78] sm:$0xff]  ;;  %v244_v40 = vld [vmem:[%s1476_s20 + $0x80] sm:$0xff]  ;;  %v245_v41 = vld [vmem:[%s1476_s20 + $0x88] sm:$0xff] }
  0x16   : > { %1365 = vmatprep.subr.bf16.mxu0 %v1364_v18  ;;  %v246_v42 = vld [vmem:[%s1476_s20 + $0x90] sm:$0xff]  ;;  %v247_v43 = vld [vmem:[%s1476_s20 + $0x98] sm:$0xff]  ;;  %v248_v44 = vld [vmem:[%s1476_s20 + $0xa0] sm:$0xff] }
  0x17   : > { %v249_v45 = vld [vmem:[%s1476_s20 + $0xa8] sm:$0xff]  ;;  %v250_v46 = vld [vmem:[%s1476_s20 + $0xb0] sm:$0xff]  ;;  %v251_v47 = vld [vmem:[%s1476_s20 + $0xb8] sm:$0xff] }
  0x18   : > { %v252_v48 = vld [vmem:[%s1476_s20 + $0xc0] sm:$0xff]  ;;  %v253_v49 = vld [vmem:[%s1476_s20 + $0xc8] sm:$0xff]  ;;  %v254_v50 = vld [vmem:[%s1476_s20 + $0xd0] sm:$0xff] }
  0x19   : > { %1367 = vmatpush3.bf16.msra.mxu0 %v1364_v18  ;;  %v255_v51 = vld [vmem:[%s1476_s20 + $0xd8] sm:$0xff]  ;;  %v256_v52 = vld [vmem:[%s1476_s20 + $0xe0] sm:$0xff]  ;;  %v257_v53 = vld [vmem:[%s1476_s20 + $0xe8] sm:$0xff] }
  0x1a   : > { %1369 = vmatprep.subr.bf16.mxu0 %v1368_v21  ;;  %v258_v54 = vld [vmem:[%s1476_s20 + $0xf0] sm:$0xff]  ;;  %v259_v55 = vld [vmem:[%s1476_s20 + $0xf8] sm:$0xff] }
  0x1d   : > { %1371 = vmatpush3.bf16.msra.mxu0 %v1368_v21 }
  0x1e   : > { %1373 = vmatprep.subr.bf16.mxu0 %v1372_v24 }
  0x21   : > { %1375 = vmatpush3.bf16.msra.mxu0 %v1372_v24 }
  0x24   : > { %1245 = vmatmul.mubr.msk.f32.vlgmr.msra.gmra.mrb[0].mxu0 %vm281_vm0, %v229_v25 }
  0x25   : > { %1247 = vmatprep.mubr.msk.f32.mxu0 %vm281_vm0, %v230_v26 }
  0x28   : > { %1248 = vmatmul.mubr.msk.f32.gmra.mrb[2].mxu0 %vm281_vm0, %v231_v27 }
  0x29   : > { %1250 = vmatprep.mubr.msk.f32.mxu0 %vm281_vm0, %v232_v28 }
  0x2c   : > { %1251 = vmatmul.mubr.msk.f32.gmra.mrb[4].mxu0 %vm281_vm0, %v233_v29 }
  0x2d   : > { %1253 = vmatprep.mubr.msk.f32.mxu0 %vm281_vm0, %v234_v30 }
  0x30   : > { %1254 = vmatmul.mubr.msk.f32.gmra.mrb[6].mxu0 %vm281_vm0, %v235_v31 }
  0x31   : > { %1256 = vmatprep.mubr.msk.f32.mxu0 %vm281_vm0, %v236_v32 }
  0x34   : > { %1257 = vmatmul.mubr.msk.f32.gmra.mrb[8].mxu0 %vm281_vm0, %v237_v33 }
  0x35   : > { %1259 = vmatprep.mubr.msk.f32.mxu0 %vm281_vm0, %v238_v34 }
  0x38   : > { %1260 = vmatmul.mubr.msk.f32.gmra.mrb[10].mxu0 %vm281_vm0, %v239_v35 }
  0x39   : > { %1262 = vmatprep.mubr.msk.f32.mxu0 %vm281_vm0, %v240_v36 }
  0x3c   : > { %1263 = vmatmul.mubr.msk.f32.gmra.mrb[12].mxu0 %vm281_vm0, %v241_v37 }
  0x3d   : > { %1265 = vmatprep.mubr.msk.f32.mxu0 %vm281_vm0, %v242_v38 }
  0x40   : > { %1266 = vmatmul.mubr.msk.f32.gmra.mrb[14].mxu0 %vm281_vm0, %v243_v39 }
  0x41   : > { %1268 = vmatprep.mubr.msk.f32.mxu0 %vm281_vm0, %v244_v40 }
  0x44   : > { %1269 = vmatmul.mubr.msk.f32.gmra.mrb[16].mxu0 %vm281_vm0, %v245_v41 }
  0x45   : > { %1271 = vmatprep.mubr.msk.f32.mxu0 %vm281_vm0, %v246_v42 }
  0x48   : > { %1272 = vmatmul.mubr.msk.f32.gmra.mrb[18].mxu0 %vm281_vm0, %v247_v43 }
  0x49   : > { %1274 = vmatprep.mubr.msk.f32.mxu0 %vm281_vm0, %v248_v44 }
  0x4c   : > { %1275 = vmatmul.mubr.msk.f32.gmra.mrb[20].mxu0 %vm281_vm0, %v249_v45 }
  0x4d   : > { %1277 = vmatprep.mubr.msk.f32.mxu0 %vm281_vm0, %v250_v46 }
  0x50   : > { %1278 = vmatmul.mubr.msk.f32.gmra.mrb[22].mxu0 %vm281_vm0, %v251_v47 }
  0x51   : > { %1280 = vmatprep.mubr.msk.f32.mxu0 %vm281_vm0, %v252_v48 }
  0x54   : > { %1281 = vmatmul.mubr.msk.f32.gmra.mrb[24].mxu0 %vm281_vm0, %v253_v49 }
  0x55   : > { %1283 = vmatprep.mubr.msk.f32.mxu0 %vm281_vm0, %v254_v50 }
  0x58   : > { %1284 = vmatmul.mubr.msk.f32.gmra.mrb[26].mxu0 %vm281_vm0, %v255_v51 }
  0x59   : > { %1286 = vmatprep.mubr.msk.f32.mxu0 %vm281_vm0, %v256_v52 }
  0x5c   : > { %1287 = vmatmul.mubr.msk.f32.gmra.mrb[28].mxu0 %vm281_vm0, %v257_v53 }
  0x5d   : > { %1289 = vmatprep.mubr.msk.f32.mxu0 %vm281_vm0, %v258_v54 }
  0x60   : > { %1290 = vmatmul.mubr.msk.f32.gmra.mrb[30].mxu0 %vm281_vm0, %v259_v55 }
  0xf7   : > { %v1246_v60 = vpop.f32.mrb[0].mxu0 }
  0xf8   : > { %v450_v61 = vadd.f32 %v1246_v60, %v1569_v59  ;;  %v444_v62 = vpop.f32.mrb[1].mxu0 }
  0xf9   : > { %v445_v63 = vadd.f32 %v1569_v59, %v444_v62 }
  0xfa   : > { %v604_v2 = vmax.f32 %v450_v61, 0.0 }
  0xfb   : > { %v603_v0 = vmax.f32 %v445_v63, 0.0  ;;  %v1249_v1 = vpop.f32.mrb[2].mxu0 }
  0xfc   : > { %v460_v3 = vadd.f32 %v1249_v1, %v1569_v59  ;;  %v454_v4 = vpop.f32.mrb[3].mxu0 }
  0xfd   : > { %v455_v5 = vadd.f32 %v1569_v59, %v454_v4  ;;  %1300 = vmatprep.mubr.msk.f32.mxu1 %vm646_vm1, %v603_v0 }
  0xfe   : > { %1301 = vmatmul.mubr.msk.f32.vlgmr.msra.gmra.mrb[0].mxu1 %vm646_vm1, %v604_v2  ;;  %v606_v8 = vmax.f32 %v460_v3, 0.0 }
  0xff   : > { %v605_v6 = vmax.f32 %v455_v5, 0.0  ;;  %v1252_v7 = vpop.f32.mrb[4].mxu0 }
 0x100   : > { %v470_v9 = vadd.f32 %v1252_v7, %v1569_v59  ;;  %v464_v10 = vpop.f32.mrb[5].mxu0 }
 0x101   : > { %v465_v11 = vadd.f32 %v1569_v59, %v464_v10  ;;  %1303 = vmatprep.mubr.msk.f32.mxu1 %vm646_vm1, %v605_v6 }
 0x102   : > { %1304 = vmatmul.mubr.msk.f32.gmra.mrb[2].mxu1 %vm646_vm1, %v606_v8  ;;  %v608_v14 = vmax.f32 %v470_v9, 0.0 }
 0x103   : > { %v607_v12 = vmax.f32 %v465_v11, 0.0  ;;  %v1255_v13 = vpop.f32.mrb[6].mxu0 }
 0x104   : > { %v480_v15 = vadd.f32 %v1255_v13, %v1569_v59  ;;  %v474_v16 = vpop.f32.mrb[7].mxu0 }
 0x105   : > { %v475_v17 = vadd.f32 %v1569_v59, %v474_v16  ;;  %1306 = vmatprep.mubr.msk.f32.mxu1 %vm646_vm1, %v607_v12 }
 0x106   : > { %1307 = vmatmul.mubr.msk.f32.gmra.mrb[4].mxu1 %vm646_vm1, %v608_v14  ;;  %v610_v20 = vmax.f32 %v480_v15, 0.0 }
 0x107   : > { %v609_v18 = vmax.f32 %v475_v17, 0.0  ;;  %v1258_v19 = vpop.f32.mrb[8].mxu0 }
 0x108   : > { %v490_v21 = vadd.f32 %v1258_v19, %v1569_v59  ;;  %v484_v22 = vpop.f32.mrb[9].mxu0 }
 0x109   : > { %v485_v23 = vadd.f32 %v1569_v59, %v484_v22  ;;  %1309 = vmatprep.mubr.msk.f32.mxu1 %vm646_vm1, %v609_v18 }
 0x10a   : > { %1310 = vmatmul.mubr.msk.f32.gmra.mrb[6].mxu1 %vm646_vm1, %v610_v20  ;;  %v612_v26 = vmax.f32 %v490_v21, 0.0 }
 0x10b   : > { %v611_v24 = vmax.f32 %v485_v23, 0.0  ;;  %v1261_v25 = vpop.f32.mrb[10].mxu0 }
 0x10c   : > { %v500_v27 = vadd.f32 %v1261_v25, %v1569_v59  ;;  %v494_v28 = vpop.f32.mrb[11].mxu0 }
 0x10d   : > { %v495_v29 = vadd.f32 %v1569_v59, %v494_v28  ;;  %1312 = vmatprep.mubr.msk.f32.mxu1 %vm646_vm1, %v611_v24 }
 0x10e   : > { %1313 = vmatmul.mubr.msk.f32.gmra.mrb[8].mxu1 %vm646_vm1, %v612_v26  ;;  %v614_v32 = vmax.f32 %v500_v27, 0.0 }
 0x10f   : > { %v613_v30 = vmax.f32 %v495_v29, 0.0  ;;  %v1264_v31 = vpop.f32.mrb[12].mxu0  ;;  %v1638_v29 = vld [vmem:[%s1750_s4] ss:$0 sm:$0xff] }
 0x110   : > { %v510_v33 = vadd.f32 %v1264_v31, %v1569_v59  ;;  %v504_v34 = vpop.f32.mrb[13].mxu0 }
 0x111   : > { %v505_v35 = vadd.f32 %v1569_v59, %v504_v34  ;;  %1315 = vmatprep.mubr.msk.f32.mxu1 %vm646_vm1, %v613_v30 }
 0x112   : > { %1316 = vmatmul.mubr.msk.f32.gmra.mrb[10].mxu1 %vm646_vm1, %v614_v32  ;;  %v616_v38 = vmax.f32 %v510_v33, 0.0 }
 0x113   : > { %v615_v36 = vmax.f32 %v505_v35, 0.0  ;;  %v1267_v37 = vpop.f32.mrb[14].mxu0 }
 0x114   : > { %v520_v39 = vadd.f32 %v1267_v37, %v1569_v59  ;;  %v514_v40 = vpop.f32.mrb[15].mxu0 }
 0x115   : > { %v515_v41 = vadd.f32 %v1569_v59, %v514_v40  ;;  %1318 = vmatprep.mubr.msk.f32.mxu1 %vm646_vm1, %v615_v36 }
 0x116   : > { %1319 = vmatmul.mubr.msk.f32.gmra.mrb[12].mxu1 %vm646_vm1, %v616_v38  ;;  %v618_v44 = vmax.f32 %v520_v39, 0.0 }
 0x117   : > { %v617_v42 = vmax.f32 %v515_v41, 0.0  ;;  %v1270_v43 = vpop.f32.mrb[16].mxu0 }
 0x118   : > { %v530_v45 = vadd.f32 %v1270_v43, %v1569_v59  ;;  %v524_v46 = vpop.f32.mrb[17].mxu0 }
 0x119   : > { %v525_v47 = vadd.f32 %v1569_v59, %v524_v46  ;;  %1321 = vmatprep.mubr.msk.f32.mxu1 %vm646_vm1, %v617_v42 }
 0x11a   : > { %1322 = vmatmul.mubr.msk.f32.gmra.mrb[14].mxu1 %vm646_vm1, %v618_v44  ;;  %v620_v50 = vmax.f32 %v530_v45, 0.0 }
 0x11b   : > { %v619_v48 = vmax.f32 %v525_v47, 0.0  ;;  %v1273_v49 = vpop.f32.mrb[18].mxu0 }
 0x11c   : > { %v540_v51 = vadd.f32 %v1273_v49, %v1569_v59  ;;  %v534_v52 = vpop.f32.mrb[19].mxu0 }
 0x11d   : > { %v535_v53 = vadd.f32 %v1569_v59, %v534_v52  ;;  %1324 = vmatprep.mubr.msk.f32.mxu1 %vm646_vm1, %v619_v48 }
 0x11e   : > { %1325 = vmatmul.mubr.msk.f32.gmra.mrb[16].mxu1 %vm646_vm1, %v620_v50  ;;  %v622_v56 = vmax.f32 %v540_v51, 0.0 }
 0x11f   : > { %v621_v54 = vmax.f32 %v535_v53, 0.0  ;;  %v1276_v55 = vpop.f32.mrb[20].mxu0 }
 0x120   : > { %v550_v57 = vadd.f32 %v1276_v55, %v1569_v59  ;;  %v544_v58 = vpop.f32.mrb[21].mxu0 }
 0x121   : > { %v545_v60 = vadd.f32 %v1569_v59, %v544_v58  ;;  %1327 = vmatprep.mubr.msk.f32.mxu1 %vm646_vm1, %v621_v54 }
 0x122   : > { %1328 = vmatmul.mubr.msk.f32.gmra.mrb[18].mxu1 %vm646_vm1, %v622_v56  ;;  %v624_v63 = vmax.f32 %v550_v57, 0.0 }
 0x123   : > { %v623_v61 = vmax.f32 %v545_v60, 0.0  ;;  %v1279_v62 = vpop.f32.mrb[22].mxu0 }
 0x124   : > { %v560_v0 = vadd.f32 %v1279_v62, %v1569_v59  ;;  %v554_v1 = vpop.f32.mrb[23].mxu0 }
 0x125   : > { %v555_v2 = vadd.f32 %v1569_v59, %v554_v1  ;;  %1330 = vmatprep.mubr.msk.f32.mxu1 %vm646_vm1, %v623_v61 }
 0x126   : > { %1331 = vmatmul.mubr.msk.f32.gmra.mrb[20].mxu1 %vm646_vm1, %v624_v63  ;;  %v626_v5 = vmax.f32 %v560_v0, 0.0 }
 0x127   : > { %v625_v3 = vmax.f32 %v555_v2, 0.0  ;;  %v1282_v4 = vpop.f32.mrb[24].mxu0 }
 0x128   : > { %v570_v6 = vadd.f32 %v1282_v4, %v1569_v59  ;;  %v564_v7 = vpop.f32.mrb[25].mxu0 }
 0x129   : > { %v565_v8 = vadd.f32 %v1569_v59, %v564_v7  ;;  %1333 = vmatprep.mubr.msk.f32.mxu1 %vm646_vm1, %v625_v3 }
 0x12a   : > { %1334 = vmatmul.mubr.msk.f32.gmra.mrb[22].mxu1 %vm646_vm1, %v626_v5  ;;  %v628_v11 = vmax.f32 %v570_v6, 0.0 }
 0x12b   : > { %v627_v9 = vmax.f32 %v565_v8, 0.0  ;;  %v1285_v10 = vpop.f32.mrb[26].mxu0 }
 0x12c   : > { %v580_v12 = vadd.f32 %v1285_v10, %v1569_v59  ;;  %v574_v13 = vpop.f32.mrb[27].mxu0 }
 0x12d   : > { %v575_v14 = vadd.f32 %v1569_v59, %v574_v13  ;;  %1336 = vmatprep.mubr.msk.f32.mxu1 %vm646_vm1, %v627_v9 }
 0x12e   : > { %1337 = vmatmul.mubr.msk.f32.gmra.mrb[24].mxu1 %vm646_vm1, %v628_v11  ;;  %v630_v17 = vmax.f32 %v580_v12, 0.0 }
 0x12f   : > { %v629_v15 = vmax.f32 %v575_v14, 0.0  ;;  %v1288_v16 = vpop.f32.mrb[28].mxu0 }
 0x130   : > { %v590_v18 = vadd.f32 %v1288_v16, %v1569_v59  ;;  %v584_v19 = vpop.f32.mrb[29].mxu0 }
 0x131   : > { %v585_v20 = vadd.f32 %v1569_v59, %v584_v19  ;;  %1339 = vmatprep.mubr.msk.f32.mxu1 %vm646_vm1, %v629_v15 }
 0x132   : > { %1340 = vmatmul.mubr.msk.f32.gmra.mrb[26].mxu1 %vm646_vm1, %v630_v17  ;;  %v632_v23 = vmax.f32 %v590_v18, 0.0 }
 0x133   : > { %v631_v21 = vmax.f32 %v585_v20, 0.0  ;;  %v1291_v22 = vpop.f32.mrb[30].mxu0 }
 0x134   : > { %v600_v24 = vadd.f32 %v1291_v22, %v1569_v59  ;;  %v594_v25 = vpop.f32.mrb[31].mxu0 }
 0x135   : > { %v595_v26 = vadd.f32 %v1569_v59, %v594_v25  ;;  %1342 = vmatprep.mubr.msk.f32.mxu1 %vm646_vm1, %v631_v21 }
 0x136   : > { %1343 = vmatmul.mubr.msk.f32.gmra.mrb[28].mxu1 %vm646_vm1, %v632_v23  ;;  %v634_v28 = vmax.f32 %v600_v24, 0.0 }
 0x137   : > { %v633_v27 = vmax.f32 %v595_v26, 0.0 }
 0x139   : > { %1345 = vmatprep.mubr.msk.f32.mxu1 %vm646_vm1, %v633_v27 }
 0x13a   : > { %1346 = vmatmul.mubr.msk.f32.gmra.mrb[30].mxu1 %vm646_vm1, %v634_v28 }
 0x1d1   : > { %v1302_v59 = vpop.f32.mrb[0].mxu1 }
 0x1d2   : > { %v815_v30 = vadd.f32 %v1302_v59, %v1638_v29  ;;  %v809_v31 = vpop.f32.mrb[1].mxu1 }
 0x1d3   : > { %v810_v32 = vadd.f32 %v1638_v29, %v809_v31 }
 0x1d4   : > { %970 = vst.msk [vmem:[%s1645_s21 + $0x8] sm:$0xff] %vm968_vm2, %v815_v30 }
 0x1d5   : > { %969 = vst.msk [vmem:[%s1645_s21] sm:$0xff] %vm968_vm2, %v810_v32  ;;  %v1305_v33 = vpop.f32.mrb[2].mxu1 }
 0x1d6   : > { %v825_v34 = vadd.f32 %v1305_v33, %v1638_v29  ;;  %v819_v35 = vpop.f32.mrb[3].mxu1 }
 0x1d7   : > { %v820_v36 = vadd.f32 %v1638_v29, %v819_v35 }
 0x1d8   : > { %972 = vst.msk [vmem:[%s1645_s21 + $0x18] sm:$0xff] %vm968_vm2, %v825_v34 }
 0x1d9   : > { %971 = vst.msk [vmem:[%s1645_s21 + $0x10] sm:$0xff] %vm968_vm2, %v820_v36  ;;  %v1308_v37 = vpop.f32.mrb[4].mxu1 }
 0x1da   : > { %v835_v38 = vadd.f32 %v1308_v37, %v1638_v29  ;;  %v829_v39 = vpop.f32.mrb[5].mxu1 }
 0x1db   : > { %v830_v40 = vadd.f32 %v1638_v29, %v829_v39 }
 0x1dc   : > { %974 = vst.msk [vmem:[%s1645_s21 + $0x28] sm:$0xff] %vm968_vm2, %v835_v38 }
 0x1dd   : > { %973 = vst.msk [vmem:[%s1645_s21 + $0x20] sm:$0xff] %vm968_vm2, %v830_v40  ;;  %v1311_v41 = vpop.f32.mrb[6].mxu1 }
 0x1de   : > { %v845_v42 = vadd.f32 %v1311_v41, %v1638_v29  ;;  %v839_v43 = vpop.f32.mrb[7].mxu1 }
 0x1df   : > { %v840_v44 = vadd.f32 %v1638_v29, %v839_v43 }
 0x1e0   : > { %976 = vst.msk [vmem:[%s1645_s21 + $0x38] sm:$0xff] %vm968_vm2, %v845_v42 }
 0x1e1   : > { %975 = vst.msk [vmem:[%s1645_s21 + $0x30] sm:$0xff] %vm968_vm2, %v840_v44  ;;  %v1314_v45 = vpop.f32.mrb[8].mxu1 }
 0x1e2   : > { %v855_v46 = vadd.f32 %v1314_v45, %v1638_v29  ;;  %v849_v47 = vpop.f32.mrb[9].mxu1 }
 0x1e3   : > { %v850_v48 = vadd.f32 %v1638_v29, %v849_v47 }
 0x1e4   : > { %978 = vst.msk [vmem:[%s1645_s21 + $0x48] sm:$0xff] %vm968_vm2, %v855_v46 }
 0x1e5   : > { %977 = vst.msk [vmem:[%s1645_s21 + $0x40] sm:$0xff] %vm968_vm2, %v850_v48  ;;  %v1317_v49 = vpop.f32.mrb[10].mxu1 }
 0x1e6   : > { %v865_v50 = vadd.f32 %v1317_v49, %v1638_v29  ;;  %v859_v51 = vpop.f32.mrb[11].mxu1 }
 0x1e7   : > { %v860_v52 = vadd.f32 %v1638_v29, %v859_v51 }
 0x1e8   : > { %980 = vst.msk [vmem:[%s1645_s21 + $0x58] sm:$0xff] %vm968_vm2, %v865_v50 }
 0x1e9   : > { %979 = vst.msk [vmem:[%s1645_s21 + $0x50] sm:$0xff] %vm968_vm2, %v860_v52  ;;  %v1320_v53 = vpop.f32.mrb[12].mxu1 }
 0x1ea   : > { %v875_v54 = vadd.f32 %v1320_v53, %v1638_v29  ;;  %v869_v55 = vpop.f32.mrb[13].mxu1 }
 0x1eb   : > { %v870_v56 = vadd.f32 %v1638_v29, %v869_v55 }
 0x1ec   : > { %982 = vst.msk [vmem:[%s1645_s21 + $0x68] sm:$0xff] %vm968_vm2, %v875_v54 }
 0x1ed   : > { %981 = vst.msk [vmem:[%s1645_s21 + $0x60] sm:$0xff] %vm968_vm2, %v870_v56  ;;  %v1323_v57 = vpop.f32.mrb[14].mxu1 }
 0x1ee   : > { %v885_v58 = vadd.f32 %v1323_v57, %v1638_v29  ;;  %v879_v60 = vpop.f32.mrb[15].mxu1 }
 0x1ef   : > { %v880_v61 = vadd.f32 %v1638_v29, %v879_v60 }
 0x1f0   : > { %984 = vst.msk [vmem:[%s1645_s21 + $0x78] sm:$0xff] %vm968_vm2, %v885_v58 }
 0x1f1   : > { %983 = vst.msk [vmem:[%s1645_s21 + $0x70] sm:$0xff] %vm968_vm2, %v880_v61  ;;  %v1326_v62 = vpop.f32.mrb[16].mxu1 }
 0x1f2   : > { %v895_v63 = vadd.f32 %v1326_v62, %v1638_v29  ;;  %v889_v0 = vpop.f32.mrb[17].mxu1 }
 0x1f3   : > { %v890_v1 = vadd.f32 %v1638_v29, %v889_v0 }
 0x1f4   : > { %986 = vst.msk [vmem:[%s1645_s21 + $0x88] sm:$0xff] %vm968_vm2, %v895_v63 }
 0x1f5   : > { %985 = vst.msk [vmem:[%s1645_s21 + $0x80] sm:$0xff] %vm968_vm2, %v890_v1  ;;  %v1329_v2 = vpop.f32.mrb[18].mxu1 }
 0x1f6   : > { %v905_v3 = vadd.f32 %v1329_v2, %v1638_v29  ;;  %v899_v4 = vpop.f32.mrb[19].mxu1 }
 0x1f7   : > { %v900_v5 = vadd.f32 %v1638_v29, %v899_v4 }
 0x1f8   : > { %988 = vst.msk [vmem:[%s1645_s21 + $0x98] sm:$0xff] %vm968_vm2, %v905_v3 }
 0x1f9   : > { %987 = vst.msk [vmem:[%s1645_s21 + $0x90] sm:$0xff] %vm968_vm2, %v900_v5  ;;  %v1332_v6 = vpop.f32.mrb[20].mxu1 }
 0x1fa   : > { %v915_v7 = vadd.f32 %v1332_v6, %v1638_v29  ;;  %v909_v8 = vpop.f32.mrb[21].mxu1 }
 0x1fb   : > { %v910_v9 = vadd.f32 %v1638_v29, %v909_v8 }
 0x1fc   : > { %990 = vst.msk [vmem:[%s1645_s21 + $0xa8] sm:$0xff] %vm968_vm2, %v915_v7 }
 0x1fd   : > { %989 = vst.msk [vmem:[%s1645_s21 + $0xa0] sm:$0xff] %vm968_vm2, %v910_v9  ;;  %v1335_v10 = vpop.f32.mrb[22].mxu1 }
 0x1fe   : > { %v925_v11 = vadd.f32 %v1335_v10, %v1638_v29  ;;  %v919_v12 = vpop.f32.mrb[23].mxu1 }
 0x1ff   : > { %v920_v13 = vadd.f32 %v1638_v29, %v919_v12 }
 0x200   : > { %992 = vst.msk [vmem:[%s1645_s21 + $0xb8] sm:$0xff] %vm968_vm2, %v925_v11 }
 0x201   : > { %991 = vst.msk [vmem:[%s1645_s21 + $0xb0] sm:$0xff] %vm968_vm2, %v920_v13  ;;  %v1338_v14 = vpop.f32.mrb[24].mxu1 }
 0x202   : > { %v935_v15 = vadd.f32 %v1338_v14, %v1638_v29  ;;  %v929_v16 = vpop.f32.mrb[25].mxu1 }
 0x203   : > { %v930_v17 = vadd.f32 %v1638_v29, %v929_v16 }
 0x204   : > { %994 = vst.msk [vmem:[%s1645_s21 + $0xc8] sm:$0xff] %vm968_vm2, %v935_v15 }
 0x205   : > { %993 = vst.msk [vmem:[%s1645_s21 + $0xc0] sm:$0xff] %vm968_vm2, %v930_v17  ;;  %v1341_v18 = vpop.f32.mrb[26].mxu1 }
 0x206   : > { %v945_v19 = vadd.f32 %v1341_v18, %v1638_v29  ;;  %v939_v20 = vpop.f32.mrb[27].mxu1 }
 0x207   : > { %v940_v21 = vadd.f32 %v1638_v29, %v939_v20 }
 0x208   : > { %996 = vst.msk [vmem:[%s1645_s21 + $0xd8] sm:$0xff] %vm968_vm2, %v945_v19 }
 0x209   : > { %995 = vst.msk [vmem:[%s1645_s21 + $0xd0] sm:$0xff] %vm968_vm2, %v940_v21  ;;  %v1344_v22 = vpop.f32.mrb[28].mxu1 }
 0x20a   : > { %v955_v23 = vadd.f32 %v1344_v22, %v1638_v29  ;;  %v949_v24 = vpop.f32.mrb[29].mxu1 }
 0x20b   : > { %v950_v25 = vadd.f32 %v1638_v29, %v949_v24 }
 0x20c   : > { %998 = vst.msk [vmem:[%s1645_s21 + $0xe8] sm:$0xff] %vm968_vm2, %v955_v23 }
 0x20d   : > { %997 = vst.msk [vmem:[%s1645_s21 + $0xe0] sm:$0xff] %vm968_vm2, %v950_v25  ;;  %v1347_v26 = vpop.f32.mrb[30].mxu1 }
 0x20e   : > { %v965_v27 = vadd.f32 %v1347_v26, %v1638_v29  ;;  %v959_v28 = vpop.f32.mrb[31].mxu1 }
 0x20f   : > { %v960_v59 = vadd.f32 %v1638_v29, %v959_v28 }
 0x210   : > { %1000 = vst.msk [vmem:[%s1645_s21 + $0xf8] sm:$0xff] %vm968_vm2, %v965_v27 }
 0x211   : > { %999 = vst.msk [vmem:[%s1645_s21 + $0xf0] sm:$0xff] %vm968_vm2, %v960_v59 }
 0x212 PF: > { %s15_s18 = sadd.s32 1, %s1398_s18  }
 0x213   : > { %p12_p4 = scmp.ge.s32.totalorder %s15_s18, 4  }
 0x215   :  { %14 = sbr.rel (!%p12_p4) target bundleno = 1 (0x1), region = 70 }

</bundles_post_ra>
